<compile_context>
chip_gen: v6e
topology: v6e:2x2x1
jax: 0.10.0
libtpu: 0.0.40
codegen_flags: <defaults>
</compile_context>

<pallas_src>
import math

import jax
import jax.numpy as jnp
from jax import lax
from jax.experimental import pallas as pl
from jax.experimental.pallas import tpu as pltpu

VOCAB = 50             # vocablen
EMBED_DIM = 32         # embedding_dim
NUM_LAYERS = 4         # GatedGraphConv num_layers
NUM_CLASSES = 104
NUM_CLASSES_PAD = 128  # lane-dense output, sliced to 104 in the wrapper
NUM_EDGE_TYPES = 7

# parameter slab row layout ([P_ROWS, 128] f32)
ROW_WFOLD = 0                       # rows 0..4*D-1   : Wfold_l = W_l @ gru_w_top   [L*D, 4D]
ROW_GRU_BOT = NUM_LAYERS * EMBED_DIM  # rows 128..159 : gru_w_bot (x -> [r|z|0|h_n]) [D, 4D]
ROW_GRU_B = ROW_GRU_BOT + EMBED_DIM   # row 160       : combined GRU biases [1, 4D]
ROW_OUT_B = ROW_GRU_B + 1             # row 161       : out Linear bias (zero-padded past 104)
ROW_GATE = ROW_OUT_B + 1              # row 162       : cols 0:D = gate_w, col D = gate_b
ROW_OUT_W = 168                       # rows 168..199 : out_w.T zero-padded to 128 cols
P_ROWS = ROW_OUT_W + EMBED_DIM        # 200


def ggnn_kernel(nvalid_ref, x_ref, a_ref, p_ref, o_ref):
    """One grid step = one graph; everything resident in VMEM.

    nvalid_ref : SMEM (B,) int32   valid (non-padded) node count per graph (scalar prefetch)
    x_ref      : [N, D]  f32       initial node embeddings (rows >= nvalid are zero)
    a_ref      : [N, N]  bf16      dense weighted adjacency (A[dst, src] = sum edge_weight)
    p_ref      : [200, 128] f32    packed parameter slab (resident across the grid)
    o_ref      : [8, 128] f32      padded logits (row 0 is the result; lane-dense store)
    """
    D = EMBED_DIM
    b = pl.program_id(0)
    N = x_ref.shape[0]

    A = a_ref[...]                                        # [N, N] bf16 (MXU-native)
    x = x_ref[...]                                        # [N, D] f32
    w_bot = p_ref[ROW_GRU_BOT:ROW_GRU_BOT + D, :]         # [D, 4D]  x -> [r | z | 0 | h_n]
    gru_b = p_ref[ROW_GRU_B:ROW_GRU_B + 1, :]             # [1, 4D]

    # ---- GatedGraphConv: statically unrolled 4-layer propagation + GRUCell ----
    for l in range(NUM_LAYERS):
        wfold = p_ref[l * D:(l + 1) * D, :]               # [D, 4D] = W_l @ gru_w_top (static slice)
        t = jnp.dot(x, wfold, preferred_element_type=jnp.float32)             # [N, 4D]
        gi = jnp.dot(A, t.astype(jnp.bfloat16),
                     preferred_element_type=jnp.float32)                      # propagate (A @ ...)
        gh = jnp.dot(x, w_bot, preferred_element_type=jnp.float32)            # independent, overlaps
        gates = gi + gh + gru_b                                               # [N, 4D] = [r|z|i_n|h_n]
        rz = jax.nn.sigmoid(gates[:, 0:2 * D])            # one contiguous EUP issue for r and z
        r = rz[:, 0:D]
        z = rz[:, D:2 * D]
        n = jnp.tanh(gates[:, 2 * D:3 * D] + r * gates[:, 3 * D:4 * D])
        x = (1.0 - z) * n + z * x

    # ---- GlobalAttention pool (single graph, masked over valid nodes) ----
    gate_w = p_ref[ROW_GATE:ROW_GATE + 1, 0:D]            # [1, D]
    gate_b = p_ref[ROW_GATE:ROW_GATE + 1, D:D + 1]        # [1, 1]
    gate = jax.nn.sigmoid(
        jnp.sum(x * gate_w, axis=-1, keepdims=True) + gate_b)                 # [N, 1]

    row = lax.broadcasted_iota(jnp.int32, (N, 1), 0)
    valid = row < nvalid_ref[b]
    gate = jnp.where(valid, gate, -jnp.inf)               # mask padded rows (exp -> 0)

    gmax = jnp.max(gate, axis=0, keepdims=True)
    e = jnp.exp(gate - gmax)
    denom = jnp.sum(e, axis=0, keepdims=True)
    alpha = e * pl.reciprocal(denom, approx=True)         # EUP reciprocal (free slot)
    hg = jnp.sum(alpha * x, axis=0, keepdims=True)        # [1, D]

    # ---- out = Linear(hg) -> [1, 128], stored lane-dense as an (8,128) tile ----
    out_w = p_ref[ROW_OUT_W:ROW_OUT_W + D, :]             # [D, 128]
    out_b = p_ref[ROW_OUT_B:ROW_OUT_B + 1, :]             # [1, 128]
    logits = jnp.dot(hg, out_w, preferred_element_type=jnp.float32) + out_b
    o_ref[...] = jnp.broadcast_to(logits, (8, NUM_CLASSES_PAD))


def init_params(key):
    D = EMBED_DIM
    ks = jax.random.split(key, 11)
    bd = 1.0 / math.sqrt(D)

    def u(k, shape, bound):
        return jax.random.uniform(k, shape, jnp.float32, -bound, bound)

    return {
        # nn.Embedding(vocablen, D), nn.Embedding(7, D)  (N(0,1) init like PyTorch)
        'embed': jax.random.normal(ks[0], (VOCAB, D), jnp.float32),
        'edge_embed': jax.random.normal(ks[1], (NUM_EDGE_TYPES, D), jnp.float32),
        # GatedGraphConv.weight: [num_layers, D, D]
        'ggnn_w': u(ks[2], (NUM_LAYERS, D, D), bd),
        # GRUCell(D, D)  (PyTorch gate order r, z, n)
        'gru_wih': u(ks[3], (3 * D, D), bd),
        'gru_whh': u(ks[4], (3 * D, D), bd),
        'gru_bih': u(ks[5], (3 * D,), bd),
        'gru_bhh': u(ks[6], (3 * D,), bd),
        # mlp_gate: Linear(D, 1)
        'gate_w': u(ks[7], (1, D), bd),
        'gate_b': u(ks[8], (1,), bd),
        # out: Linear(D, 104)
        'out_w': u(ks[9], (NUM_CLASSES, D), bd),
        'out_b': u(ks[10], (NUM_CLASSES,), bd),
    }


def prepare_params(params):
    """One-time preprocessing: fold W_l into the GRU path and pack ONE VMEM slab."""
    D = EMBED_DIM
    wih, whh = params['gru_wih'], params['gru_whh']
    bih, bhh = params['gru_bih'], params['gru_bhh']
    zeros_dd = jnp.zeros((D, D), jnp.float32)

    # gru_w_top maps agg -> [r | z | i_n | 0];  gru_w_bot maps x -> [r | z | 0 | h_n]
    gru_w_top = jnp.concatenate(
        [wih[0:D].T, wih[D:2 * D].T, wih[2 * D:].T, zeros_dd], axis=1)        # [D, 4D]
    gru_w_bot = jnp.concatenate(
        [whh[0:D].T, whh[D:2 * D].T, zeros_dd, whh[2 * D:].T], axis=1)        # [D, 4D]

    # Fold the per-layer propagation weight into the agg path:
    #   gi = A @ (x @ W_l) @ gru_w_top == A @ (x @ (W_l @ gru_w_top))
    wfold = jnp.einsum('lij,jk->lik',
                       params['ggnn_w'].astype(jnp.float32), gru_w_top)       # [L, D, 4D]

    gru_b = jnp.concatenate([bih[0:D] + bhh[0:D],
                             bih[D:2 * D] + bhh[D:2 * D],
                             bih[2 * D:],
                             bhh[2 * D:]]).astype(jnp.float32)                # [4D] == [128]

    slab = jnp.zeros((P_ROWS, 128), jnp.float32)
    slab = slab.at[ROW_WFOLD:ROW_WFOLD + NUM_LAYERS * D].set(
        wfold.reshape(NUM_LAYERS * D, 4 * D))
    slab = slab.at[ROW_GRU_BOT:ROW_GRU_BOT + D].set(gru_w_bot)
    slab = slab.at[ROW_GRU_B].set(gru_b)
    slab = slab.at[ROW_OUT_B, :NUM_CLASSES].set(params['out_b'])
    slab = slab.at[ROW_GATE, 0:D].set(params['gate_w'].reshape(D))
    slab = slab.at[ROW_GATE, D].set(params['gate_b'][0])
    slab = slab.at[ROW_OUT_W:ROW_OUT_W + D, :NUM_CLASSES].set(params['out_w'].T)

    return {
        'embed': params['embed'],
        'edge_embed': params['edge_embed'],
        'slab': slab,
    }


def _vmem_limit_bytes(n_pad):
    """Explicit scoped-VMEM limit (v5e default is 16MiB; keep below v7x's 64MiB/TC)."""
    a_bytes = n_pad * n_pad * 2                 # bf16 A tile
    x_bytes = n_pad * EMBED_DIM * 4
    slab_bytes = P_ROWS * 128 * 4
    out_bytes = 8 * NUM_CLASSES_PAD * 4
    work = 12 * n_pad * 128 * 4                 # in-kernel f32 temporaries
    est = 2 * (a_bytes + x_bytes + slab_bytes + out_bytes) + work + (4 << 20)
    return int(min(60 << 20, max(32 << 20, est)))


def ggnn_forward(graphs, prepared):
    """graphs: list of (node_ids [N], edges [2,E], edge_types [E]).  Returns [B, 104]."""
    D = EMBED_DIM
    B = len(graphs)
    n_max = max(int(g[0].shape[0]) for g in graphs)
    n_pad = max(8, ((n_max + 7) // 8) * 8)      # sublane multiple
    # TODO(synk): for graphs with hundreds of nodes, pad n_pad to a multiple of 128
    # (lane-dense A) and, past ~2800 nodes on v7x, row-tile A via a blocked BlockSpec
    # instead of one dense VMEM-resident A per graph.

    # ---- plain-JAX glue: embedding gathers + dense adjacency build (per graph) ----
    x_list, a_list, nv = [], [], []
    for node_ids, edges, edge_types in graphs:
        x0 = prepared['embed'][node_ids].astype(jnp.float32)                  # [N, D]
        edge_weight = jnp.mean(prepared['edge_embed'][edge_types - 1], axis=1)  # [E]
        N = int(node_ids.shape[0])
        A = jnp.zeros((n_pad, n_pad), jnp.float32).at[edges[1], edges[0]].add(edge_weight)
        x_list.append(jnp.zeros((n_pad, D), jnp.float32).at[:N].set(x0))
        a_list.append(A.astype(jnp.bfloat16))   # O(N^2) traffic in bf16
        nv.append(N)

    x_b = jnp.stack(x_list)                     # [B, n_pad, D]   f32
    a_b = jnp.stack(a_list)                     # [B, n_pad, n_pad] bf16
    nvalid = jnp.array(nv, jnp.int32)           # [B]
    slab = prepared['slab']                     # [200, 128]      f32

    # advisory cost estimate for XLA scheduling around the custom call
    fl_layer = 2 * (2 * n_pad * D * 4 * D) + 2 * n_pad * n_pad * 4 * D
    ce = pl.CostEstimate(
        flops=B * (NUM_LAYERS * fl_layer + 2 * D * NUM_CLASSES_PAD + 4 * n_pad * D),
        transcendentals=B * (NUM_LAYERS * 3 * D * n_pad + 3 * n_pad),
        bytes_accessed=int(x_b.size * 4 + a_b.size * 2 + slab.size * 4
                           + B * 8 * NUM_CLASSES_PAD * 4 + B * 4),
    )

    grid_spec = pltpu.PrefetchScalarGridSpec(
        num_scalar_prefetch=1,                  # nvalid -> SMEM, per-graph scalar
        grid=(B,),
        in_specs=[
            pl.BlockSpec((None, n_pad, D), lambda b, nv: (b, 0, 0)),          # x  (per graph)
            pl.BlockSpec((None, n_pad, n_pad), lambda b, nv: (b, 0, 0)),      # A  (per graph, bf16)
            pl.BlockSpec((P_ROWS, 128), lambda b, nv: (0, 0)),                # params (resident)
        ],
        out_specs=pl.BlockSpec((None, 8, NUM_CLASSES_PAD), lambda b, nv: (b, 0, 0)),
    )

    out_pad = pl.pallas_call(
        ggnn_kernel,
        out_shape=jax.ShapeDtypeStruct((B, 8, NUM_CLASSES_PAD), jnp.float32),
        grid_spec=grid_spec,
        compiler_params=pltpu.CompilerParams(
            dimension_semantics=("parallel",),          # v7x: shard graphs across both TCs
            vmem_limit_bytes=_vmem_limit_bytes(n_pad)),
        cost_estimate=ce,
    )(nvalid, x_b, a_b, slab)

    return out_pad[:, 0, :NUM_CLASSES]          # [B, 104]


def ggnn_reference(node_ids, edges, edge_types, params):
    """Pure-JAX reference mirroring the PyTorch module (for validation)."""
    D = EMBED_DIM
    x = params['embed'][node_ids].astype(jnp.float32)
    edge_weight = jnp.mean(params['edge_embed'][edge_types - 1], axis=1)
    N = x.shape[0]
    A = jnp.zeros((N, N), jnp.float32).at[edges[1], edges[0]].add(edge_weight)
    wih, whh = params['gru_wih'], params['gru_whh']
    bih, bhh = params['gru_bih'], params['gru_bhh']
    for l in range(NUM_LAYERS):
        m = x @ params['ggnn_w'][l]
        agg = A @ m
        gi = agg @ wih.T + bih
        gh = x @ whh.T + bhh
        r = jax.nn.sigmoid(gi[:, :D] + gh[:, :D])
        z = jax.nn.sigmoid(gi[:, D:2 * D] + gh[:, D:2 * D])
        n = jnp.tanh(gi[:, 2 * D:] + r * gh[:, 2 * D:])
        x = (1.0 - z) * n + z * x
    gate = jax.nn.sigmoid(x @ params['gate_w'].T + params['gate_b'])          # [N, 1]
    alpha = jax.nn.softmax(gate, axis=0)
    hg = jnp.sum(alpha * x, axis=0)
    return (hg @ params['out_w'].T + params['out_b'])[None, :]


if __name__ == "__main__":
    key = jax.random.PRNGKey(0)
    kp, kg = jax.random.split(key)

    params = init_params(kp)
    prepared = prepare_params(params)

    # small synthetic batch: 2 graphs (8 nodes / 12 edges, 6 nodes / 10 edges)
    graphs = []
    rng = kg
    for (N, E) in [(8, 12), (6, 10)]:
        rng, kn, ke, kt = jax.random.split(rng, 4)
        node_ids = jax.random.randint(kn, (N,), 0, VOCAB)                     # data['node_ids']
        edges = jax.random.randint(ke, (2, E), 0, N)                          # data['edges']
        edge_types = jax.random.randint(kt, (E,), 1, NUM_EDGE_TYPES + 1)      # data['edge_types'] 1..7
        graphs.append((node_ids, edges, edge_types))

    out = ggnn_forward(graphs, prepared)
    jax.block_until_ready(out)
    assert out.shape == (len(graphs), NUM_CLASSES) and out.dtype == jnp.float32

    # per-graph validation vs. the pure-f32 reference
    # (bf16 A storage + approx reciprocal in the pooled softmax -> ~1e-3 abs error)
    for i, (nid, ed, et) in enumerate(graphs):
        ref = ggnn_reference(nid, ed, et, params)
        err = float(jnp.max(jnp.abs(out[i:i + 1] - ref)))
        assert jnp.allclose(out[i:i + 1], ref, rtol=1e-2, atol=1e-2), (
            f"graph {i}: max abs err {err}")

    print("KERNEL_OK")
</pallas_src>

<mosaic_0001>
module attributes {stable_mosaic.version = 11 : i64} {
  func.func @ggnn_kernel(%arg0: i32, %arg1: memref<2xi32, #tpu.memory_space<smem>>, %arg2: memref<1x8x32xf32, #tpu.memory_space<vmem>>, %arg3: memref<1x8x8xbf16, #tpu.memory_space<vmem>>, %arg4: memref<200x128xf32, #tpu.memory_space<vmem>>, %arg5: memref<1x8x128xf32, #tpu.memory_space<vmem>>) attributes {dimension_semantics = [#tpu.dimension_semantics<parallel>], iteration_bounds = array<i64: 2>, scalar_prefetch = 1 : i64, scratch_operands = 0 : i64, tpu.core_type = #tpu.core_type<tc>, window_params = [{transform_indices = @transform_0, window_bounds = array<i64: 1, 8, 32>}, {transform_indices = @transform_1, window_bounds = array<i64: 1, 8, 8>}, {pipeline_mode = #tpu.pipeline_mode<synchronous>, transform_indices = @transform_2, window_bounds = array<i64: 200, 128>}, {transform_indices = @transform_3, window_bounds = array<i64: 1, 8, 128>}]} {
    %c0 = arith.constant 0 : index
    %c0_0 = arith.constant 0 : index
    %c0_1 = arith.constant 0 : index
    %0 = vector.load %arg3[%c0, %c0_0, %c0_1] : memref<1x8x8xbf16, #tpu.memory_space<vmem>>, vector<1x8x8xbf16>
    %1 = vector.shape_cast %0 : vector<1x8x8xbf16> to vector<8x8xbf16>
    %c0_2 = arith.constant 0 : index
    %c0_3 = arith.constant 0 : index
    %c0_4 = arith.constant 0 : index
    %2 = vector.load %arg2[%c0_2, %c0_3, %c0_4] : memref<1x8x32xf32, #tpu.memory_space<vmem>>, vector<1x8x32xf32>
    %3 = vector.shape_cast %2 : vector<1x8x32xf32> to vector<8x32xf32>
    %c128 = arith.constant 128 : index
    %c0_5 = arith.constant 0 : index
    %4 = vector.load %arg4[%c128, %c0_5] : memref<200x128xf32, #tpu.memory_space<vmem>>, vector<32x128xf32>
    %c160 = arith.constant 160 : index
    %c0_6 = arith.constant 0 : index
    %5 = vector.load %arg4[%c160, %c0_6] : memref<200x128xf32, #tpu.memory_space<vmem>>, vector<1x128xf32>
    %c0_7 = arith.constant 0 : index
    %c0_8 = arith.constant 0 : index
    %6 = vector.load %arg4[%c0_7, %c0_8] : memref<200x128xf32, #tpu.memory_space<vmem>>, vector<32x128xf32>
    %cst = arith.constant dense<0.000000e+00> : vector<8x128xf32>
    %7 = tpu.matmul %3, %6, %cst {dimension_numbers = #tpu.dot_dimension_numbers<[1], [0], [0], [1], [0, 0, 1, 1], [], []>} : vector<8x32xf32>, vector<32x128xf32>, vector<8x128xf32> -> vector<8x128xf32>
    %8 = arith.truncf %7 : vector<8x128xf32> to vector<8x128xbf16>
    %cst_9 = arith.constant dense<0.000000e+00> : vector<8x128xf32>
    %9 = tpu.matmul %1, %8, %cst_9 {dimension_numbers = #tpu.dot_dimension_numbers<[1], [0], [0], [1], [0, 0, 1, 1], [], []>} : vector<8x8xbf16>, vector<8x128xbf16>, vector<8x128xf32> -> vector<8x128xf32>
    %cst_10 = arith.constant dense<0.000000e+00> : vector<8x128xf32>
    %10 = tpu.matmul %3, %4, %cst_10 {dimension_numbers = #tpu.dot_dimension_numbers<[1], [0], [0], [1], [0, 0, 1, 1], [], []>} : vector<8x32xf32>, vector<32x128xf32>, vector<8x128xf32> -> vector<8x128xf32>
    %11 = arith.addf %9, %10 : vector<8x128xf32>
    %12 = vector.broadcast %5 : vector<1x128xf32> to vector<8x128xf32>
    %13 = arith.addf %11, %12 : vector<8x128xf32>
    %14 = vector.extract_strided_slice %13 {offsets = [0, 0], sizes = [8, 64], strides = [1, 1]} : vector<8x128xf32> to vector<8x64xf32>
    %15 = arith.negf %14 : vector<8x64xf32>
    %16 = math.exp %15 : vector<8x64xf32>
    %cst_11 = arith.constant 1.000000e+00 : f32
    %17 = vector.broadcast %cst_11 : f32 to vector<8x64xf32>
    %18 = arith.addf %17, %16 : vector<8x64xf32>
    %19 = arith.divf %17, %18 : vector<8x64xf32>
    %20 = vector.extract_strided_slice %19 {offsets = [0, 0], sizes = [8, 32], strides = [1, 1]} : vector<8x64xf32> to vector<8x32xf32>
    %21 = vector.extract_strided_slice %19 {offsets = [0, 32], sizes = [8, 32], strides = [1, 1]} : vector<8x64xf32> to vector<8x32xf32>
    %22 = vector.extract_strided_slice %13 {offsets = [0, 64], sizes = [8, 32], strides = [1, 1]} : vector<8x128xf32> to vector<8x32xf32>
    %23 = vector.extract_strided_slice %13 {offsets = [0, 96], sizes = [8, 32], strides = [1, 1]} : vector<8x128xf32> to vector<8x32xf32>
    %24 = arith.mulf %20, %23 : vector<8x32xf32>
    %25 = arith.addf %22, %24 : vector<8x32xf32>
    %26 = math.tanh %25 : vector<8x32xf32>
    %cst_12 = arith.constant 1.000000e+00 : f32
    %27 = vector.broadcast %cst_12 : f32 to vector<8x32xf32>
    %28 = arith.subf %27, %21 : vector<8x32xf32>
    %29 = arith.mulf %28, %26 : vector<8x32xf32>
    %30 = arith.mulf %21, %3 : vector<8x32xf32>
    %31 = arith.addf %29, %30 : vector<8x32xf32>
    %c32 = arith.constant 32 : index
    %c0_13 = arith.constant 0 : index
    %32 = vector.load %arg4[%c32, %c0_13] : memref<200x128xf32, #tpu.memory_space<vmem>>, vector<32x128xf32>
    %cst_14 = arith.constant dense<0.000000e+00> : vector<8x128xf32>
    %33 = tpu.matmul %31, %32, %cst_14 {dimension_numbers = #tpu.dot_dimension_numbers<[1], [0], [0], [1], [0, 0, 1, 1], [], []>} : vector<8x32xf32>, vector<32x128xf32>, vector<8x128xf32> -> vector<8x128xf32>
    %34 = arith.truncf %33 : vector<8x128xf32> to vector<8x128xbf16>
    %cst_15 = arith.constant dense<0.000000e+00> : vector<8x128xf32>
    %35 = tpu.matmul %1, %34, %cst_15 {dimension_numbers = #tpu.dot_dimension_numbers<[1], [0], [0], [1], [0, 0, 1, 1], [], []>} : vector<8x8xbf16>, vector<8x128xbf16>, vector<8x128xf32> -> vector<8x128xf32>
    %cst_16 = arith.constant dense<0.000000e+00> : vector<8x128xf32>
    %36 = tpu.matmul %31, %4, %cst_16 {dimension_numbers = #tpu.dot_dimension_numbers<[1], [0], [0], [1], [0, 0, 1, 1], [], []>} : vector<8x32xf32>, vector<32x128xf32>, vector<8x128xf32> -> vector<8x128xf32>
    %37 = arith.addf %35, %36 : vector<8x128xf32>
    %38 = vector.broadcast %5 : vector<1x128xf32> to vector<8x128xf32>
    %39 = arith.addf %37, %38 : vector<8x128xf32>
    %40 = vector.extract_strided_slice %39 {offsets = [0, 0], sizes = [8, 64], strides = [1, 1]} : vector<8x128xf32> to vector<8x64xf32>
    %41 = arith.negf %40 : vector<8x64xf32>
    %42 = math.exp %41 : vector<8x64xf32>
    %cst_17 = arith.constant 1.000000e+00 : f32
    %43 = vector.broadcast %cst_17 : f32 to vector<8x64xf32>
    %44 = arith.addf %43, %42 : vector<8x64xf32>
    %45 = arith.divf %43, %44 : vector<8x64xf32>
    %46 = vector.extract_strided_slice %45 {offsets = [0, 0], sizes = [8, 32], strides = [1, 1]} : vector<8x64xf32> to vector<8x32xf32>
    %47 = vector.extract_strided_slice %45 {offsets = [0, 32], sizes = [8, 32], strides = [1, 1]} : vector<8x64xf32> to vector<8x32xf32>
    %48 = vector.extract_strided_slice %39 {offsets = [0, 64], sizes = [8, 32], strides = [1, 1]} : vector<8x128xf32> to vector<8x32xf32>
    %49 = vector.extract_strided_slice %39 {offsets = [0, 96], sizes = [8, 32], strides = [1, 1]} : vector<8x128xf32> to vector<8x32xf32>
    %50 = arith.mulf %46, %49 : vector<8x32xf32>
    %51 = arith.addf %48, %50 : vector<8x32xf32>
    %52 = math.tanh %51 : vector<8x32xf32>
    %cst_18 = arith.constant 1.000000e+00 : f32
    %53 = vector.broadcast %cst_18 : f32 to vector<8x32xf32>
    %54 = arith.subf %53, %47 : vector<8x32xf32>
    %55 = arith.mulf %54, %52 : vector<8x32xf32>
    %56 = arith.mulf %47, %31 : vector<8x32xf32>
    %57 = arith.addf %55, %56 : vector<8x32xf32>
    %c64 = arith.constant 64 : index
    %c0_19 = arith.constant 0 : index
    %58 = vector.load %arg4[%c64, %c0_19] : memref<200x128xf32, #tpu.memory_space<vmem>>, vector<32x128xf32>
    %cst_20 = arith.constant dense<0.000000e+00> : vector<8x128xf32>
    %59 = tpu.matmul %57, %58, %cst_20 {dimension_numbers = #tpu.dot_dimension_numbers<[1], [0], [0], [1], [0, 0, 1, 1], [], []>} : vector<8x32xf32>, vector<32x128xf32>, vector<8x128xf32> -> vector<8x128xf32>
    %60 = arith.truncf %59 : vector<8x128xf32> to vector<8x128xbf16>
    %cst_21 = arith.constant dense<0.000000e+00> : vector<8x128xf32>
    %61 = tpu.matmul %1, %60, %cst_21 {dimension_numbers = #tpu.dot_dimension_numbers<[1], [0], [0], [1], [0, 0, 1, 1], [], []>} : vector<8x8xbf16>, vector<8x128xbf16>, vector<8x128xf32> -> vector<8x128xf32>
    %cst_22 = arith.constant dense<0.000000e+00> : vector<8x128xf32>
    %62 = tpu.matmul %57, %4, %cst_22 {dimension_numbers = #tpu.dot_dimension_numbers<[1], [0], [0], [1], [0, 0, 1, 1], [], []>} : vector<8x32xf32>, vector<32x128xf32>, vector<8x128xf32> -> vector<8x128xf32>
    %63 = arith.addf %61, %62 : vector<8x128xf32>
    %64 = vector.broadcast %5 : vector<1x128xf32> to vector<8x128xf32>
    %65 = arith.addf %63, %64 : vector<8x128xf32>
    %66 = vector.extract_strided_slice %65 {offsets = [0, 0], sizes = [8, 64], strides = [1, 1]} : vector<8x128xf32> to vector<8x64xf32>
    %67 = arith.negf %66 : vector<8x64xf32>
    %68 = math.exp %67 : vector<8x64xf32>
    %cst_23 = arith.constant 1.000000e+00 : f32
    %69 = vector.broadcast %cst_23 : f32 to vector<8x64xf32>
    %70 = arith.addf %69, %68 : vector<8x64xf32>
    %71 = arith.divf %69, %70 : vector<8x64xf32>
    %72 = vector.extract_strided_slice %71 {offsets = [0, 0], sizes = [8, 32], strides = [1, 1]} : vector<8x64xf32> to vector<8x32xf32>
    %73 = vector.extract_strided_slice %71 {offsets = [0, 32], sizes = [8, 32], strides = [1, 1]} : vector<8x64xf32> to vector<8x32xf32>
    %74 = vector.extract_strided_slice %65 {offsets = [0, 64], sizes = [8, 32], strides = [1, 1]} : vector<8x128xf32> to vector<8x32xf32>
    %75 = vector.extract_strided_slice %65 {offsets = [0, 96], sizes = [8, 32], strides = [1, 1]} : vector<8x128xf32> to vector<8x32xf32>
    %76 = arith.mulf %72, %75 : vector<8x32xf32>
    %77 = arith.addf %74, %76 : vector<8x32xf32>
    %78 = math.tanh %77 : vector<8x32xf32>
    %cst_24 = arith.constant 1.000000e+00 : f32
    %79 = vector.broadcast %cst_24 : f32 to vector<8x32xf32>
    %80 = arith.subf %79, %73 : vector<8x32xf32>
    %81 = arith.mulf %80, %78 : vector<8x32xf32>
    %82 = arith.mulf %73, %57 : vector<8x32xf32>
    %83 = arith.addf %81, %82 : vector<8x32xf32>
    %c96 = arith.constant 96 : index
    %c0_25 = arith.constant 0 : index
    %84 = vector.load %arg4[%c96, %c0_25] : memref<200x128xf32, #tpu.memory_space<vmem>>, vector<32x128xf32>
    %cst_26 = arith.constant dense<0.000000e+00> : vector<8x128xf32>
    %85 = tpu.matmul %83, %84, %cst_26 {dimension_numbers = #tpu.dot_dimension_numbers<[1], [0], [0], [1], [0, 0, 1, 1], [], []>} : vector<8x32xf32>, vector<32x128xf32>, vector<8x128xf32> -> vector<8x128xf32>
    %86 = arith.truncf %85 : vector<8x128xf32> to vector<8x128xbf16>
    %cst_27 = arith.constant dense<0.000000e+00> : vector<8x128xf32>
    %87 = tpu.matmul %1, %86, %cst_27 {dimension_numbers = #tpu.dot_dimension_numbers<[1], [0], [0], [1], [0, 0, 1, 1], [], []>} : vector<8x8xbf16>, vector<8x128xbf16>, vector<8x128xf32> -> vector<8x128xf32>
    %cst_28 = arith.constant dense<0.000000e+00> : vector<8x128xf32>
    %88 = tpu.matmul %83, %4, %cst_28 {dimension_numbers = #tpu.dot_dimension_numbers<[1], [0], [0], [1], [0, 0, 1, 1], [], []>} : vector<8x32xf32>, vector<32x128xf32>, vector<8x128xf32> -> vector<8x128xf32>
    %89 = arith.addf %87, %88 : vector<8x128xf32>
    %90 = vector.broadcast %5 : vector<1x128xf32> to vector<8x128xf32>
    %91 = arith.addf %89, %90 : vector<8x128xf32>
    %92 = vector.extract_strided_slice %91 {offsets = [0, 0], sizes = [8, 64], strides = [1, 1]} : vector<8x128xf32> to vector<8x64xf32>
    %93 = arith.negf %92 : vector<8x64xf32>
    %94 = math.exp %93 : vector<8x64xf32>
    %cst_29 = arith.constant 1.000000e+00 : f32
    %95 = vector.broadcast %cst_29 : f32 to vector<8x64xf32>
    %96 = arith.addf %95, %94 : vector<8x64xf32>
    %97 = arith.divf %95, %96 : vector<8x64xf32>
    %98 = vector.extract_strided_slice %97 {offsets = [0, 0], sizes = [8, 32], strides = [1, 1]} : vector<8x64xf32> to vector<8x32xf32>
    %99 = vector.extract_strided_slice %97 {offsets = [0, 32], sizes = [8, 32], strides = [1, 1]} : vector<8x64xf32> to vector<8x32xf32>
    %100 = vector.extract_strided_slice %91 {offsets = [0, 64], sizes = [8, 32], strides = [1, 1]} : vector<8x128xf32> to vector<8x32xf32>
    %101 = vector.extract_strided_slice %91 {offsets = [0, 96], sizes = [8, 32], strides = [1, 1]} : vector<8x128xf32> to vector<8x32xf32>
    %102 = arith.mulf %98, %101 : vector<8x32xf32>
    %103 = arith.addf %100, %102 : vector<8x32xf32>
    %104 = math.tanh %103 : vector<8x32xf32>
    %cst_30 = arith.constant 1.000000e+00 : f32
    %105 = vector.broadcast %cst_30 : f32 to vector<8x32xf32>
    %106 = arith.subf %105, %99 : vector<8x32xf32>
    %107 = arith.mulf %106, %104 : vector<8x32xf32>
    %108 = arith.mulf %99, %83 : vector<8x32xf32>
    %109 = arith.addf %107, %108 : vector<8x32xf32>
    %c162 = arith.constant 162 : index
    %c0_31 = arith.constant 0 : index
    %110 = vector.load %arg4[%c162, %c0_31] : memref<200x128xf32, #tpu.memory_space<vmem>>, vector<1x32xf32>
    %c162_32 = arith.constant 162 : index
    %c32_33 = arith.constant 32 : index
    %111 = vector.load %arg4[%c162_32, %c32_33] : memref<200x128xf32, #tpu.memory_space<vmem>>, vector<1x1xf32>
    %112 = vector.broadcast %110 : vector<1x32xf32> to vector<8x32xf32>
    %113 = arith.mulf %109, %112 : vector<8x32xf32>
    %cst_34 = arith.constant dense<0.000000e+00> : vector<8xf32>
    %114 = vector.multi_reduction <add>, %113, %cst_34 [1] : vector<8x32xf32> to vector<8xf32>
    %115 = vector.shape_cast %114 : vector<8xf32> to vector<8x1xf32>
    %116 = vector.broadcast %111 : vector<1x1xf32> to vector<8x1xf32>
    %117 = arith.addf %115, %116 : vector<8x1xf32>
    %118 = arith.negf %117 : vector<8x1xf32>
    %119 = math.exp %118 : vector<8x1xf32>
    %cst_35 = arith.constant 1.000000e+00 : f32
    %120 = vector.broadcast %cst_35 : f32 to vector<8x1xf32>
    %121 = arith.addf %120, %119 : vector<8x1xf32>
    %122 = arith.divf %120, %121 : vector<8x1xf32>
    %123 = tpu.iota {dimensions = array<i32: 0>} : vector<8x1xi32>
    %124 = arith.index_cast %arg0 : i32 to index
    %125 = memref.load %arg1[%124] : memref<2xi32, #tpu.memory_space<smem>>
    %126 = vector.broadcast %125 : i32 to vector<8x1xi32>
    %127 = arith.cmpi slt, %123, %126 : vector<8x1xi32>
    %cst_36 = arith.constant 0xFF800000 : f32
    %128 = vector.broadcast %cst_36 : f32 to vector<8x1xf32>
    %129 = arith.select %127, %122, %128 : vector<8x1xi1>, vector<8x1xf32>
    %cst_37 = arith.constant dense<0xFF800000> : vector<1xf32>
    %130 = vector.multi_reduction <maximumf>, %129, %cst_37 [0] : vector<8x1xf32> to vector<1xf32>
    %131 = vector.shape_cast %130 : vector<1xf32> to vector<1x1xf32>
    %132 = vector.broadcast %131 : vector<1x1xf32> to vector<8x1xf32>
    %133 = arith.subf %129, %132 : vector<8x1xf32>
    %134 = math.exp %133 : vector<8x1xf32>
    %cst_38 = arith.constant dense<0.000000e+00> : vector<1xf32>
    %135 = vector.multi_reduction <add>, %134, %cst_38 [0] : vector<8x1xf32> to vector<1xf32>
    %136 = vector.shape_cast %135 : vector<1xf32> to vector<1x1xf32>
    %137 = tpu.reciprocal %136 {approx = true} : vector<1x1xf32> -> vector<1x1xf32>
    %138 = vector.broadcast %137 : vector<1x1xf32> to vector<8x1xf32>
    %139 = arith.mulf %134, %138 : vector<8x1xf32>
    %140 = vector.broadcast %139 : vector<8x1xf32> to vector<8x32xf32>
    %141 = arith.mulf %140, %109 : vector<8x32xf32>
    %cst_39 = arith.constant dense<0.000000e+00> : vector<32xf32>
    %142 = vector.multi_reduction <add>, %141, %cst_39 [0] : vector<8x32xf32> to vector<32xf32>
    %143 = vector.shape_cast %142 : vector<32xf32> to vector<1x32xf32>
    %c168 = arith.constant 168 : index
    %c0_40 = arith.constant 0 : index
    %144 = vector.load %arg4[%c168, %c0_40] : memref<200x128xf32, #tpu.memory_space<vmem>>, vector<32x128xf32>
    %c161 = arith.constant 161 : index
    %c0_41 = arith.constant 0 : index
    %145 = vector.load %arg4[%c161, %c0_41] : memref<200x128xf32, #tpu.memory_space<vmem>>, vector<1x128xf32>
    %cst_42 = arith.constant dense<0.000000e+00> : vector<1x128xf32>
    %146 = tpu.matmul %143, %144, %cst_42 {dimension_numbers = #tpu.dot_dimension_numbers<[1], [0], [0], [1], [0, 0, 1, 1], [], []>} : vector<1x32xf32>, vector<32x128xf32>, vector<1x128xf32> -> vector<1x128xf32>
    %147 = arith.addf %146, %145 : vector<1x128xf32>
    %148 = vector.shape_cast %147 : vector<1x128xf32> to vector<1x128xf32>
    %149 = vector.broadcast %148 : vector<1x128xf32> to vector<8x128xf32>
    %c0_43 = arith.constant 0 : index
    %c0_44 = arith.constant 0 : index
    %c0_45 = arith.constant 0 : index
    %150 = vector.load %arg5[%c0_43, %c0_44, %c0_45] : memref<1x8x128xf32, #tpu.memory_space<vmem>>, vector<1x8x128xf32>
    %151 = vector.shape_cast %150 : vector<1x8x128xf32> to vector<8x128xf32>
    %152 = vector.shape_cast %149 : vector<8x128xf32> to vector<1x8x128xf32>
    tpu.vector_store %arg5[%c0_43, %c0_44, %c0_45], %152 {strides = array<i32>} : memref<1x8x128xf32, #tpu.memory_space<vmem>>, vector<1x8x128xf32>,
    return
  }
  func.func @transform_0(%arg0: i32, %arg1: memref<2xi32, #tpu.memory_space<smem>>) -> (i32, i32, i32) {
    %c0_i32 = arith.constant 0 : i32
    %c0_i32_0 = arith.constant 0 : i32
    %c0_i32_1 = arith.constant 0 : i32
    return %arg0, %c0_i32, %c0_i32_0 : i32, i32, i32
  }
  func.func @transform_1(%arg0: i32, %arg1: memref<2xi32, #tpu.memory_space<smem>>) -> (i32, i32, i32) {
    %c0_i32 = arith.constant 0 : i32
    %c0_i32_0 = arith.constant 0 : i32
    %c0_i32_1 = arith.constant 0 : i32
    return %arg0, %c0_i32, %c0_i32_0 : i32, i32, i32
  }
  func.func @transform_2(%arg0: i32, %arg1: memref<2xi32, #tpu.memory_space<smem>>) -> (i32, i32) {
    %c0_i32 = arith.constant 0 : i32
    %c0_i32_0 = arith.constant 0 : i32
    %c0_i32_1 = arith.constant 0 : i32
    return %c0_i32, %c0_i32_0 : i32, i32
  }
  func.func @transform_3(%arg0: i32, %arg1: memref<2xi32, #tpu.memory_space<smem>>) -> (i32, i32, i32) {
    %c0_i32 = arith.constant 0 : i32
    %c0_i32_0 = arith.constant 0 : i32
    %c0_i32_1 = arith.constant 0 : i32
    return %arg0, %c0_i32, %c0_i32_0 : i32, i32, i32
  }
}

</mosaic_0001>

<bundles_post_ra>
// kernel: tpu_custom_call.1
= control target key start
LH: loop header
LB: loop body
LE: loop exit
PB: predicated region body
PF: predicated region fallthrough
CT: control target
= control target key end

     0   :  { %s1886_s15 = smov [#allocation3]   ;;  %s2277_s0 = inlined_call_operand.hbm [shape: s32[2], index: 0, kind: input, shape index: {}]   ;;  %s2278_s1 = inlined_call_operand.hbm [shape: f32[2,8,32], index: 1, kind: input, shape index: {}]   ;;  %s2279_s2 = inlined_call_operand.hbm [shape: bf16[2,8,8], index: 2, kind: input, shape index: {}]   ;;  %s2280_s3 = inlined_call_operand.hbm [shape: f32[200,128], index: 3, kind: input, shape index: {}]   ;;  %s2281_s4 = inlined_call_operand.hbm [shape: f32[2,8,128], index: 4, kind: output, shape index: {}]  }
   0x1   :  { %10 = dma.hbm_to_smem %s2277_s0, 16, %s1886_s15, [#allocation2] }
   0x2   :  { %1852 = dma.done.wait [#allocation2], 16 }
   0x3   :  { %1853 = vsyncadd [#allocation2], 4294967280 }
   0x4   :  { %12 = sfence }
   0x5   :  { %13 = vsyncpa [#allocation5], 0 }
   0x6   :  { %15 = vsyncpa [#allocation5 + $0x1], 0 }
   0x7   :  { %16 = vsyncpa [#allocation8], 0 }
   0x8   :  { %18 = vsyncpa [#allocation8 + $0x1], 0 }
   0x9   :  { %19 = vsyncpa [#allocation6], 0 }
   0xa   :  { %21 = vsyncpa [#allocation6 + $0x1], 0  ;;  %s1927_s18 = smov 0   ;;  %s1929_s19 = smov 0  }
   0xb   :  { %s1931_s20 = smov 0   ;;  %s1933_s21 = smov 0  }
   0xc LB: > { %s1948_s0 = sadd.s32 4294967295, %s1884_s21   ;;  %s1402_s22 = sadd.s32 4294967294, %s1884_s21   ;;  %s1884_s21 = sphi %s1933_s21, %s2303_s21   ;;  %s1880_s20 = sphi %s1931_s20, %s2302_s20   ;;  %s1876_s19 = sphi %s1929_s19, %s2301_s19   ;;  %s1872_s18 = sphi %s1927_s18, %s2300_s18  }
   0xd   : > { %p47_p0 = scmp.ne.s32.totalorder %s1876_s19, %s1872_s18  ;;  %p2282_p1 = scmp.eq.s32.totalorder %s1948_s0, 0 }
   0xe   : > { %p124_p3 = scmp.eq.s32.totalorder %s1402_s22, 1  ;;  %p1403_p5 = scmp.ge.s32.totalorder %s1884_s21, 1 }
   0xf   : > { %p1957_p4 = por %p2282_p1, %p47_p0  ;;  %p131_p7 = scmp.lt.s32.totalorder %s1884_s21, 3 }
  0x10   : > { %p1962_p6 = por %p124_p3, %p47_p0  ;;  %s1887_s26 = smov [#allocation9]  }
  0x11   : > { %s2286_s23 = scalar_select %p1957_p4, 1, 0 }
  0x12   : > { %s2287_s24 = scalar_select %p1962_p6, 1, 0 }
  0x13   : > { %p1967_p8 = pnand %p1403_p5, %p131_p7  ;;  %s143_s27 = sshll.u32 %s1887_s26, 4  ;;  %s144_s27 = int_to_ptr.vmem [resolvable:$true] %s143_s27 }
  0x14   : > { %s1981_s29 = sadd.s32 1, %s1884_s21   ;;  %s34_s30 = sadd.s32 1, %s1880_s20 }
  0x15   : > { %s2288_s25 = scalar_select %p1967_p8, 1, 0 }
  0x16   : > { %p1625_p9 = pneg %p1967_p8  ;;  %s31_s5 = ssub.s32 %s1884_s21, %s1981_s29 }
  0x17   : > { %s1739_s6 = scalar_lea.vmem %s144_s27, 3200  ;;  %p1747_p5 = scmp.lt.s32.totalorder %s144_s27, %s144_s27 }
  0x18   : > { %p1976_p11 = pnand %p1625_p9, %p2282_p1  ;;  %p1740_p13 = scmp.ne.s32.totalorder %s144_s27, %s1739_s6 }
  0x19   : > { %p1748_p7 = scmp.lt.s32.totalorder %s1739_s6, %s1739_s6 }
  0x1a   : > { %p1730_p12 = pneg %p1976_p11 }
  0x1b   : > { %p1749_p10 = por %p1748_p7, %p1747_p5 }
  0x1c   : > { %p1742_p0 = pnand %p1740_p13, %p1730_p12 }
  0x1e   : > { %p1743_p3 = pneg %p1742_p0 }
  0x20   : > { %p1750_p2 = pnand %p1749_p10, %p1743_p3 }
  0x22   : > { %1753 = shalt.err (!%p1750_p2)
}
  0x23   : > { %s1888_s7 = smov 128   ;;  %s1889_s8 = smov 8  }
  0x24   : > { %1628 = dma.hbm_to_vmem [thread:$0]  (!%p1976_p11), %s2280_s3, 3200, %s144_s27, [#allocation8], %s1888_s7, %s1888_s7, %s1889_s8  }
  0x25   : > { %p32_p9 = scmp.eq.s32.totalorder %s31_s5, 0  ;;  %p41_p10 = scmp.ne.s32.totalorder %s1880_s20, %s1876_s19 }
  0x26   : > { %p42_p2 = scmp.eq.s32.totalorder %s1884_s21, 0  ;;  %p1641_p12 = scmp.lt.s32.totalorder %s1884_s21, 2 }
  0x27   : > { %s1998_s11 = scalar_select %p32_p9, %s1880_s20, %s34_s30  }
  0x28   : > { %p43_p13 = por %p42_p2, %p41_p10  ;;  %p2290_p0 = scmp.eq.s32.totalorder %s1948_s0, 1 }
  0x29   : > { %s2007_s13 = sand.u32 1, %s1880_s20   ;;  %s1407_s14 = sshll.u32 %s1884_s21, 7 }
  0x2a   : > { %p2002_p3 = por %p2290_p0, %p41_p10  ;;  %s1406_s15 = sshll.u32 %s2007_s13, 3 }
  0x2b   : > { %s2014_s22 = scalar_lea.hbm %s2278_s1, %s1407_s14  ;;  %s161_s26 = scalar_lea.vmem [#allocation4], %s1406_s15 }
  0x2c   : > { %s2291_s12 = scalar_select %p2002_p3, 1, 0 }
  0x2d   : > { %s168_s27 = sshll.u32 %s161_s26, 4  ;;  %p2016_p11 = pnand %p1641_p12, %p43_p13  ;;  %s169_s27 = int_to_ptr.vmem [resolvable:$true] %s168_s27 }
  0x2e   : > { %s175_s30 = sand.u32 1, %s1884_s21   ;;  %s158_s5 = scalar_lea.sflag [#allocation5], %s2007_s13 }
  0x2f   : > { %s1754_s6 = scalar_lea.hbm %s2014_s22, 128  ;;  %p1756_p7 = pneg %p2016_p11 }
  0x30   : > { %p1755_p5 = scmp.ne.s32.totalorder %s2014_s22, %s1754_s6  ;;  %s1759_s9 = scalar_lea.hbm %s2278_s1, 256 }
  0x31   : > { %p1760_p2 = scmp.lt.s32.totalorder %s2014_s22, %s2278_s1  ;;  %p1761_p12 = scmp.lt.s32.totalorder %s1759_s9, %s1754_s6 }
  0x32   : > { %p1757_p9 = pnand %p1756_p7, %p1755_p5 }
  0x33   : > { %p1762_p13 = por %p1761_p12, %p1760_p2 }
  0x34   : > { %p1758_p10 = pneg %p1757_p9 }
  0x36   : > { %p1763_p0 = pnand %p1762_p13, %p1758_p10 }
  0x38   : > { %1766 = shalt.err (!%p1763_p0)
}
  0x39   : > { %s1767_s15 = scalar_lea.vmem %s169_s27, 128  ;;  %s1890_s16 = smov [#allocation4]  }
  0x3a   : > { %p1768_p1 = scmp.ne.s32.totalorder %s169_s27, %s1767_s15  ;;  %s1772_s17 = sshll.u32 %s1890_s16, 4  ;;  %s1773_s17 = int_to_ptr.vmem [resolvable:$false] %s1772_s17 }
  0x3b   : > { %s1774_s26 = scalar_lea.vmem %s1773_s17, 256  ;;  %p1775_p9 = scmp.lt.s32.totalorder %s169_s27, %s1773_s17 }
  0x3c   : > { %p1770_p6 = pnand %p1768_p1, %p1756_p7  ;;  %p1776_p3 = scmp.lt.s32.totalorder %s1774_s26, %s1767_s15 }
  0x3e   : > { %p1771_p5 = pneg %p1770_p6  ;;  %p1777_p4 = por %p1776_p3, %p1775_p9 }
  0x40   : > { %p1778_p8 = pnand %p1777_p4, %p1771_p5 }
  0x42   : > { %1781 = shalt.err (!%p1778_p8)
}
  0x43   : > { %1632 = dma.hbm_to_vmem [thread:$0]  (!%p2016_p11), %s2014_s22, 128, %s169_s27, %s158_s5  }
  0x44   : > { %s1408_s6 = sshll.u32 %s2007_s13, 2  ;;  %s1409_s7 = sshll.u32 %s1884_s21, 6 }
  0x45   : > { %s2047_s10 = scalar_lea.hbm %s2279_s2, %s1409_s7  ;;  %s179_s14 = scalar_lea.vmem [#allocation7], %s1408_s6 }
  0x46   : > { %s186_s15 = sshll.u32 %s179_s14, 4  ;;  %s176_s16 = scalar_lea.sflag [#allocation8], %s175_s30  ;;  %s187_s15 = int_to_ptr.vmem [resolvable:$true] %s186_s15 }
  0x47   : > { %s1782_s17 = scalar_lea.hbm %s2047_s10, 64  ;;  %s1787_s27 = scalar_lea.hbm %s2279_s2, 128 }
  0x48   : > { %p1783_p1 = scmp.ne.s32.totalorder %s2047_s10, %s1782_s17  ;;  %p1788_p8 = scmp.lt.s32.totalorder %s2047_s10, %s2279_s2 }
  0x49   : > { %p1789_p3 = scmp.lt.s32.totalorder %s1787_s27, %s1782_s17 }
  0x4a   : > { %p1785_p4 = pnand %p1783_p1, %p1756_p7 }
  0x4b   : > { %p1790_p10 = por %p1789_p3, %p1788_p8 }
  0x4c   : > { %p1786_p6 = pneg %p1785_p4 }
  0x4e   : > { %p1791_p2 = pnand %p1790_p10, %p1786_p6 }
  0x50   : > { %1794 = shalt.err (!%p1791_p2)
}
  0x51   : > { %s1795_s6 = scalar_lea.vmem %s187_s15, 64  ;;  %s1891_s30 = smov [#allocation7]  }
  0x52   : > { %p1796_p12 = scmp.ne.s32.totalorder %s187_s15, %s1795_s6  ;;  %s1800_s7 = sshll.u32 %s1891_s30, 4  ;;  %s1801_s7 = int_to_ptr.vmem [resolvable:$false] %s1800_s7 }
  0x53   : > { %s1802_s8 = scalar_lea.vmem %s1801_s7, 128  ;;  %p1803_p5 = scmp.lt.s32.totalorder %s187_s15, %s1801_s7 }
  0x54   : > { %p1798_p13 = pnand %p1796_p12, %p1756_p7  ;;  %p1804_p9 = scmp.lt.s32.totalorder %s1802_s8, %s1795_s6 }
  0x56   : > { %p1799_p0 = pneg %p1798_p13  ;;  %p1805_p1 = por %p1804_p9, %p1803_p5 }
  0x58   : > { %p1806_p4 = pnand %p1805_p1, %p1799_p0 }
  0x5a   : > { %1809 = shalt.err (!%p1806_p4)
}
  0x5b   : > { %1635 = dma.hbm_to_vmem [thread:$0]  (!%p2016_p11), %s2047_s10, 64, %s187_s15, %s176_s16  }
  0x5c   : > { %p2293_p6 = scmp.ne.s32.totalorder %s2288_s25, 0 }
  0x5d   : > { %s2072_s9 = sand.u32 (!%p2293_p6), 1, %s1876_s19   ;;  %p2294_p7 = scmp.ne.s32.totalorder (!%p2293_p6), %s2286_s23, 0 }
  0x5e   : > { %195 = sbr.rel (%p2293_p6) target bundleno = 4332 (0x10ec), region = 32  ;;  %s1411_s14 = sshll.u32 (!%p2293_p6), %s2072_s9, 3 }
  0x5f   : > { %s198_s17 = scalar_lea.sflag (!%p2293_p6), [#allocation5], %s2072_s9  ;;  %s201_s13 = scalar_lea.vmem (!%p2293_p6), [#allocation4], %s1411_s14 }
  0x63   : > { %1855 = dma.done.wait (%p2294_p7), %s198_s17, 128  }
  0x64   : > { %1857 = vsyncadd (%p2294_p7), %s198_s17, 4294967168  ;;  %s206_s25 = sand.u32 1, %s1948_s0   ;;  %s1412_s28 = sshll.u32 %s2072_s9, 2 }
  0x65   : > { %s207_s10 = scalar_lea.sflag [#allocation8], %s206_s25  ;;  %s2084_s15 = scalar_lea.vmem [#allocation7], %s1412_s28 }
  0x66   : > { %1859 = dma.done.wait (%p2294_p7), %s207_s10, 64  }
  0x67   : > { %1861 = vsyncadd (%p2294_p7), %s207_s10, 4294967232  ;;  %p2295_p11 = scmp.eq.s32.totalorder %s1948_s0, 0 }
  0x69   : > { %1863 = dma.done.wait (%p2295_p11), [#allocation8], 3200   ;;  %p2296_p8 = pmov %p2295_p11 }
  0x6a   : > { %v1892_v0 = vmov 0.0   ;;  %vm1893_vm0 = vmmov 0   ;;  %v253_v1 = vld [vmem:[#allocation9 + $0x18] sm:$0xff]  ;;  %v252_v2 = vld [vmem:[#allocation9 + $0x10] sm:$0xff]  ;;  %v251_v4 = vld [vmem:[#allocation9 + $0x8] sm:$0xff]  ;;  %vm254_vm1 = vcmask 261120  }
  0x6b   : > { %1865 = vsyncadd (%p2296_p8), [#allocation8], 4294964096  ;;  %1492 = vmatprep.subr.mxu0 %v1892_v0  ;;  %1500 = vmatprep.mubr.msk.f32.mxu0 %vm1893_vm0, %v1892_v0  ;;  %v2100_v3 = vld [vmem:[#allocation9 + $0x98] sm:$0xff]  ;;  %v250_v5 = vld [vmem:[#allocation9] sm:$0xff]  ;;  %vm403_vm2 = vcmask 1043456   ;;  %vm399_vm3 = vcmask 64512  }
  0x6c   : > { %1503 = vmatprep.subr.mxu1 %v1892_v0  ;;  %1511 = vmatprep.mubr.msk.f32.mxu1 %vm1893_vm0, %v1892_v0  ;;  %v2106_v6 = vld [vmem:[%s201_s13] sm:$0xff]  ;;  %v2122_v9 = vld [vmem:[#allocation9 + $0x80] sm:$0xff]  ;;  %v2132_v14 = vld [vmem:[%s2084_s15] sm:$0xf]  ;;  %s1894_s23 = smov 32   ;;  %s1895_s16 = smov 64  }
  0x6d   : > { %1493 = vmatpush3.msra.mxu0 %v253_v1  ;;  %1504 = vmatpush3.msra.mxu1 %v2100_v3  ;;  %v2114_v7 = vld [vmem:[#allocation9 + $0x90] sm:$0xff]  ;;  %v2118_v8 = vld [vmem:[#allocation9 + $0x88] sm:$0xff]  ;;  %v2147_v17 = vld [vmem:[#allocation9 + $0xa0] ss:$0 sm:$0xff]  ;;  %s1896_s22 = smov 96   ;;  %s1163_s27 = sld [smem:[#allocation3 + %s1948_s0]] }
  0x6e   : > { %1494 = vmatprep.subr.mxu0 %v1892_v0  ;;  %1505 = vmatprep.subr.mxu1 %v1892_v0  ;;  %v483_v32 = vld [vmem:[#allocation9 + $0x38] sm:$0xff]  ;;  %v482_v33 = vld [vmem:[#allocation9 + $0x30] sm:$0xff]  ;;  %v481_v34 = vld [vmem:[#allocation9 + $0x28] sm:$0xff]  ;;  %vm1167_vm5 = vcmask 269568   ;;  %vm1193_vm6 = vcmask 523520   ;;  %s1436_s5 = sshll.u32 %s1948_s0, 7 }
  0x6f   : > { %1495 = vmatpush3.msra.mxu0 %v252_v2  ;;  %1506 = vmatpush3.msra.mxu1 %v2114_v7  ;;  %v480_v36 = vld [vmem:[#allocation9 + $0x20] sm:$0xff]  ;;  %v702_v1 = vld [vmem:[#allocation9 + $0x58] sm:$0xff]  ;;  %v701_v2 = vld [vmem:[#allocation9 + $0x50] sm:$0xff]  ;;  %s241_s26 = scalar_lea.vmem [#allocation10], %s1411_s14  ;;  %s1298_s8 = scalar_lea.hbm %s2281_s4, %s1436_s5 }
  0x70   : > { %1496 = vmatprep.subr.mxu0 %v1892_v0  ;;  %1507 = vmatprep.subr.mxu1 %v1892_v0  ;;  %s1300_s6 = sshll.u32 %s241_s26, 4  ;;  %s1287_s17 = scalar_lea.sflag [#allocation6], %s2072_s9  ;;  %s1301_s6 = int_to_ptr.vmem [resolvable:$true] %s1300_s6 }
  0x71   : > { %1497 = vmatpush3.msra.mxu0 %v251_v4  ;;  %1508 = vmatpush3.msra.mxu1 %v2118_v8  ;;  %v700_v4 = vld [vmem:[#allocation9 + $0x48] sm:$0xff]  ;;  %s1810_s13 = scalar_lea.vmem %s1301_s6, 128  ;;  %p2297_p10 = scmp.ne.s32.totalorder %s2291_s12, 0 }
  0x72   : > { %1498 = vmatprep.subr.mxu0 %v1892_v0  ;;  %1509 = vmatprep.subr.mxu1 %v1892_v0  ;;  %p1811_p3 = scmp.ne.s32.totalorder %s1301_s6, %s1810_s13  ;;  %s1898_s25 = smov [#allocation10]  }
  0x73   : > { %1499 = vmatpush3.msra.mxu0 %v250_v5  ;;  %1510 = vmatpush3.msra.mxu1 %v2122_v9  ;;  %v699_v5 = vld [vmem:[#allocation9 + $0x40] sm:$0xff]  ;;  %s1814_s0 = sshll.u32 %s1898_s25, 4  ;;  %s1815_s0 = int_to_ptr.vmem [resolvable:$false] %s1814_s0 }
  0x74   : > { %1501 = vmatmul.mubr.msk.f32.vlgmr.msra.gmra.mxu0 %vm254_vm1, %v2106_v6  ;;  %1514 = vmatprep.subr.bf16.mxu0 %v1892_v0  ;;  %p1812_p2 = pnand %p1811_p3, %p2297_p10  ;;  %s1816_s14 = scalar_lea.vmem %s1815_s0, 256 }
  0x75   : > { %1516 = vmatprep.mubr.msk.bf16.mxu0 %vm1893_vm0, %v1892_v0  ;;  %1512 = vmatmul.mubr.msk.f32.vlgmr.msra.gmra.mxu1 %vm254_vm1, %v2106_v6  ;;  %p1817_p13 = scmp.lt.s32.totalorder %s1301_s6, %s1815_s0  ;;  %p1818_p0 = scmp.lt.s32.totalorder %s1816_s14, %s1810_s13 }
  0x76   : > { %1520 = vmatprep.subr.mxu1 %v1892_v0  ;;  %1528 = vmatprep.mubr.msk.f32.mxu1 %vm1893_vm0, %v1892_v0  ;;  %p1813_p12 = pneg %p1812_p2 }
  0x77   : > { %1521 = vmatpush3.msra.mxu1 %v483_v32  ;;  %p1819_p5 = por %p1818_p0, %p1817_p13 }
  0x78   : > { %1522 = vmatprep.subr.mxu1 %v1892_v0 }
  0x79   : > { %1523 = vmatpush3.msra.mxu1 %v482_v33  ;;  %p1820_p9 = pnand %p1819_p5, %p1813_p12 }
  0x7a   : > { %1524 = vmatprep.subr.mxu1 %v1892_v0 }
  0x7b   : > { %1525 = vmatpush3.msra.mxu1 %v481_v34  ;;  %v921_v34 = vld [vmem:[#allocation9 + $0x78] sm:$0xff] }
  0x7c   : > { %1526 = vmatprep.subr.mxu1 %v1892_v0 }
  0x7d   : > { %1527 = vmatpush3.msra.mxu1 %v480_v36  ;;  %v919_v36 = vld [vmem:[#allocation9 + $0x68] sm:$0xff] }
  0x7e   : > { %1542 = vmatprep.subr.bf16.mxu1 %v1892_v0 }
 0x134   : > { %v324_v10 = vpop.f32.mrf.mxu0 }
 0x135   : > { %v328_v11 = vpack.c.bf16 %v324_v10, %v324_v10  ;;  %v395_v15 = vpop.f32.mrf.mxu1 }
 0x136   : > { %v1502_v12 = vpop.f32.mrf.mxu0 }
 0x137   : > { %v405_v13 = vsel %vm403_vm2, %v328_v11, 0  ;;  %v1513_v16 = vpop.f32.mrf.mxu1 }
 0x138   : > { %1515 = vmatpush3.bf16.msra.mxu0 %v405_v13 }
 0x139   : > { %1531 = vmatprep.subr.mxu0 %v1892_v0 }
 0x13b   : > { %1517 = vmatmul.mubr.msk.bf16.vlgmr.msra.gmra.mxu0 %vm399_vm3, %v2132_v14 }
 0x13c   : > { %1532 = vmatpush3.msra.mxu0 %v2100_v3  ;;  %1539 = vmatprep.mubr.msk.f32.mxu0 %vm1893_vm0, %v1892_v0 }
 0x13d   : > { %1533 = vmatprep.subr.mxu0 %v1892_v0 }
 0x13e   : > { %1534 = vmatpush3.msra.mxu0 %v2114_v7 }
 0x13f   : > { %1535 = vmatprep.subr.mxu0 %v1892_v0 }
 0x140   : > { %1536 = vmatpush3.msra.mxu0 %v2118_v8 }
 0x141   : > { %1537 = vmatprep.subr.mxu0 %v1892_v0 }
 0x142   : > { %1538 = vmatpush3.msra.mxu0 %v2122_v9 }
 0x143   : > { %1548 = vmatprep.subr.mxu0 %v1892_v0 }
 0x1fb   : > { %v441_v18 = vpop.f32.mrf.mxu0 }
 0x1fc   : > { %v442_v19 = vadd.f32 %v441_v18, %v395_v15 }
 0x1fd   : > { %v1518_v20 = vpop.f32.mrf.mxu0 }
 0x1fe   : > { %v451_v21 = vadd.f32 %v2147_v17, %v442_v19 }
 0x1ff   : > { %v444_v22 = vpop.f32.mrf.mxu0 }
 0x200   : > { %459 = vrot.lane.b32.xlu0 %v451_v21, %s1894_s23  ;;  %v1419_v24 = vmul.f32 -1.442695, %v451_v21 }
 0x201   : > { %v1519_v23 = vpop.f32.mrf.mxu0 }
 0x202   : > { %1688 = vpow2.f32 %v1419_v24 }
 0x20f   : > { %v1689_v25 = vpop.eup %1688 }
 0x210   : > { %v455_v26 = vadd.f32 1.0, %v1689_v25 }
 0x212   : > { %1690 = vrcp.f32 %v455_v26 }
 0x21f   : > { %v1691_v27 = vpop.eup %1690 }
 0x220   : > { %v469_v38 = vsub.f32 1.0, %v1691_v27 }
 0x272   : > { %v460_v28 = vpop.permute.xlu0 %459 }
 0x273   : > { %v462_v29 = vmul.f32 %v1691_v27, %v460_v28 }
 0x275   : > { %464 = vrot.lane.b32.xlu0 %v462_v29, %s1895_s16 }
 0x2e7   : > { %v465_v30 = vpop.permute.xlu0 %464 }
 0x2e8   : > { %v467_v31 = vadd.f32 %v465_v30, %v451_v21 }
 0x2ea   : > { %1692 = vtanh.f32 %v467_v31 }
 0x2f7   : > { %v1693_v35 = vpop.eup %1692 }
 0x2f8   : > { %471 = vrot.lane.b32.xlu1 %v1693_v35, %s1896_s22  ;;  %v920_v35 = vld [vmem:[#allocation9 + $0x70] sm:$0xff] }
 0x2fc   : > { %475 = vrot.lane.b32.xlu1 %v2106_v6, %s1894_s23 }
 0x36a   : > { %v472_v37 = vpop.permute.xlu1 %471 }
 0x36b   : > { %v474_v40 = vmul.f32 %v472_v37, %v469_v38  ;;  %v918_v37 = vld [vmem:[#allocation9 + $0x60] sm:$0xff] }
 0x36e   : > { %v476_v39 = vpop.permute.xlu1 %475 }
 0x36f   : > { %v478_v41 = vmul.f32 %v1691_v27, %v476_v39 }
 0x371   : > { %v479_v42 = vadd.f32 %v478_v41, %v474_v40 }
 0x373   : > { %485 = vrot.lane.b32.xlu0 %v479_v42, %s1896_s22 }
 0x3e5   : > { %v486_v43 = vpop.permute.xlu0 %485 }
 0x3e6   : > { %1529 = vmatmul.mubr.msk.f32.vlgmr.msra.gmra.mxu1 %vm254_vm1, %v486_v43  ;;  %1540 = vmatmul.mubr.msk.f32.vlgmr.msra.gmra.mxu0 %vm254_vm1, %v486_v43 }
 0x3e7   : > { %1544 = vmatprep.mubr.msk.bf16.mxu1 %vm1893_vm0, %v1892_v0  ;;  %1556 = vmatprep.mubr.msk.f32.mxu0 %vm1893_vm0, %v1892_v0 }
 0x3e8   : > { %1549 = vmatpush3.msra.mxu0 %v702_v1 }
 0x3e9   : > { %1550 = vmatprep.subr.mxu0 %v1892_v0 }
 0x3ea   : > { %1551 = vmatpush3.msra.mxu0 %v701_v2 }
 0x3eb   : > { %1552 = vmatprep.subr.mxu0 %v1892_v0 }
 0x3ec   : > { %1553 = vmatpush3.msra.mxu0 %v700_v4 }
 0x3ed   : > { %1554 = vmatprep.subr.mxu0 %v1892_v0 }
 0x3ee   : > { %1555 = vmatpush3.msra.mxu0 %v699_v5 }
 0x3ef   : > { %1570 = vmatprep.subr.bf16.mxu0 %v1892_v0 }
 0x4a6   : > { %v555_v44 = vpop.f32.mrf.mxu1  ;;  %v626_v45 = vpop.f32.mrf.mxu0 }
 0x4a7   : > { %v559_v46 = vpack.c.bf16 %v555_v44, %v555_v44 }
 0x4a8   : > { %v1530_v47 = vpop.f32.mrf.mxu1  ;;  %v1541_v48 = vpop.f32.mrf.mxu0 }
 0x4a9   : > { %v631_v49 = vsel %vm403_vm2, %v559_v46, 0 }
 0x4aa   : > { %1543 = vmatpush3.bf16.msra.mxu1 %v631_v49 }
 0x4ab   : > { %1559 = vmatprep.subr.mxu1 %v1892_v0 }
 0x4ad   : > { %1545 = vmatmul.mubr.msk.bf16.vlgmr.msra.gmra.mxu1 %vm399_vm3, %v2132_v14 }
 0x4ae   : > { %1560 = vmatpush3.msra.mxu1 %v2100_v3  ;;  %1567 = vmatprep.mubr.msk.f32.mxu1 %vm1893_vm0, %v1892_v0 }
 0x4af   : > { %1561 = vmatprep.subr.mxu1 %v1892_v0 }
 0x4b0   : > { %1562 = vmatpush3.msra.mxu1 %v2114_v7 }
 0x4b1   : > { %1563 = vmatprep.subr.mxu1 %v1892_v0 }
 0x4b2   : > { %1564 = vmatpush3.msra.mxu1 %v2118_v8 }
 0x4b3   : > { %1565 = vmatprep.subr.mxu1 %v1892_v0 }
 0x4b4   : > { %1566 = vmatpush3.msra.mxu1 %v2122_v9 }
 0x4b5   : > { %1576 = vmatprep.subr.mxu1 %v1892_v0 }
 0x56d   : > { %v667_v50 = vpop.f32.mrf.mxu1 }
 0x56e   : > { %v668_v51 = vadd.f32 %v667_v50, %v626_v45 }
 0x56f   : > { %v1546_v52 = vpop.f32.mrf.mxu1 }
 0x570   : > { %v673_v53 = vadd.f32 %v2147_v17, %v668_v51 }
 0x571   : > { %v670_v54 = vpop.f32.mrf.mxu1 }
 0x572   : > { %681 = vrot.lane.b32.xlu1 %v673_v53, %s1894_s23  ;;  %v1423_v56 = vmul.f32 -1.442695, %v673_v53 }
 0x573   : > { %v1547_v55 = vpop.f32.mrf.mxu1 }
 0x574   : > { %1694 = vpow2.f32 %v1423_v56 }
 0x581   : > { %v1695_v57 = vpop.eup %1694 }
 0x582   : > { %v677_v58 = vadd.f32 1.0, %v1695_v57 }
 0x584   : > { %1696 = vrcp.f32 %v677_v58 }
 0x591   : > { %v1697_v59 = vpop.eup %1696 }
 0x592   : > { %v691_v10 = vsub.f32 1.0, %v1697_v59  ;;  %v697_v12 = vmul.f32 %v1697_v59, %v479_v42 }
 0x5e4   : > { %v682_v60 = vpop.permute.xlu1 %681 }
 0x5e5   : > { %v684_v61 = vmul.f32 %v1697_v59, %v682_v60 }
 0x5e7   : > { %686 = vrot.lane.b32.xlu0 %v684_v61, %s1895_s16 }
 0x659   : > { %v687_v62 = vpop.permute.xlu0 %686 }
 0x65a   : > { %v689_v63 = vadd.f32 %v687_v62, %v673_v53 }
 0x65c   : > { %1698 = vtanh.f32 %v689_v63 }
 0x669   : > { %v1699_v6 = vpop.eup %1698 }
 0x66a   : > { %693 = vrot.lane.b32.xlu1 %v1699_v6, %s1896_s22 }
 0x6dc   : > { %v694_v11 = vpop.permute.xlu1 %693 }
 0x6dd   : > { %v696_v13 = vmul.f32 %v694_v11, %v691_v10 }
 0x6df   : > { %v698_v15 = vadd.f32 %v697_v12, %v696_v13 }
 0x6e1   : > { %704 = vrot.lane.b32.xlu0 %v698_v15, %s1896_s22 }
 0x753   : > { %v705_v16 = vpop.permute.xlu0 %704 }
 0x754   : > { %1557 = vmatmul.mubr.msk.f32.vlgmr.msra.gmra.mxu0 %vm254_vm1, %v705_v16  ;;  %1568 = vmatmul.mubr.msk.f32.vlgmr.msra.gmra.mxu1 %vm254_vm1, %v705_v16  ;;  %v1897_v16 = vmov 32  }
 0x755   : > { %1572 = vmatprep.mubr.msk.bf16.mxu0 %vm1893_vm0, %v1892_v0  ;;  %1584 = vmatprep.mubr.msk.f32.mxu1 %vm1893_vm0, %v1892_v0 }
 0x756   : > { %1577 = vmatpush3.msra.mxu1 %v921_v34  ;;  %1686 = vset.pattern.permute.xlu1 %v1897_v16 }
 0x757   : > { %1578 = vmatprep.subr.mxu1 %v1892_v0  ;;  %1687 = vset.pattern.permute.xlu0 %v1897_v16 }
 0x758   : > { %1579 = vmatpush3.msra.mxu1 %v920_v35 }
 0x759   : > { %1580 = vmatprep.subr.mxu1 %v1892_v0 }
 0x75a   : > { %1581 = vmatpush3.msra.mxu1 %v919_v36 }
 0x75b   : > { %1582 = vmatprep.subr.mxu1 %v1892_v0 }
 0x75c   : > { %1583 = vmatpush3.msra.mxu1 %v918_v37 }
 0x75d   : > { %1598 = vmatprep.subr.bf16.mxu1 %v1892_v0 }
 0x814   : > { %v774_v18 = vpop.f32.mrf.mxu0  ;;  %v845_v19 = vpop.f32.mrf.mxu1 }
 0x815   : > { %v778_v20 = vpack.c.bf16 %v774_v18, %v774_v18 }
 0x816   : > { %v1558_v21 = vpop.f32.mrf.mxu0  ;;  %v1569_v22 = vpop.f32.mrf.mxu1 }
 0x817   : > { %v850_v23 = vsel %vm403_vm2, %v778_v20, 0 }
 0x818   : > { %1571 = vmatpush3.bf16.msra.mxu0 %v850_v23  ;;  %v1161_v23 = vlaneseq }
 0x819   : > { %1587 = vmatprep.subr.mxu0 %v1892_v0 }
 0x81b   : > { %1573 = vmatmul.mubr.msk.bf16.vlgmr.msra.gmra.mxu0 %vm399_vm3, %v2132_v14 }
 0x81c   : > { %1588 = vmatpush3.msra.mxu0 %v2100_v3  ;;  %1595 = vmatprep.mubr.msk.f32.mxu0 %vm1893_vm0, %v1892_v0 }
 0x81d   : > { %1589 = vmatprep.subr.mxu0 %v1892_v0 }
 0x81e   : > { %1590 = vmatpush3.msra.mxu0 %v2114_v7 }
 0x81f   : > { %1591 = vmatprep.subr.mxu0 %v1892_v0 }
 0x820   : > { %1592 = vmatpush3.msra.mxu0 %v2118_v8 }
 0x821   : > { %1593 = vmatprep.subr.mxu0 %v1892_v0 }
 0x822   : > { %1594 = vmatpush3.msra.mxu0 %v2122_v9 }
 0x823   : > { %1604 = vmatprep.subr.mxu0 %v1892_v0 }
 0x8db   : > { %v886_v24 = vpop.f32.mrf.mxu0 }
 0x8dc   : > { %v887_v25 = vadd.f32 %v886_v24, %v845_v19  ;;  %v1162_v24 = vshrl.u32 %v1161_v23, 7 }
 0x8dd   : > { %v1574_v3 = vpop.f32.mrf.mxu0 }
 0x8de   : > { %v892_v26 = vadd.f32 %v2147_v17, %v887_v25  ;;  %v1164_v25 = vstv %s1163_s27 }
 0x8df   : > { %v889_v27 = vpop.f32.mrf.mxu0  ;;  %vm1165_vm4 = vcmp.lt.s32.totalorder %v1162_v24, %v1164_v25 }
 0x8e0   : > { %900 = vrot.lane.b32.xlu1 %v892_v26, %s1894_s23  ;;  %v1427_v7 = vmul.f32 -1.442695, %v892_v26 }
 0x8e1   : > { %v1575_v28 = vpop.f32.mrf.mxu0 }
 0x8e2   : > { %1700 = vpow2.f32 %v1427_v7 }
 0x8ef   : > { %v1701_v29 = vpop.eup %1700 }
 0x8f0   : > { %v896_v30 = vadd.f32 1.0, %v1701_v29 }
 0x8f2   : > { %1702 = vrcp.f32 %v896_v30 }
 0x8ff   : > { %v1703_v8 = vpop.eup %1702 }
 0x900   : > { %v910_v39 = vsub.f32 1.0, %v1703_v8  ;;  %v916_v41 = vmul.f32 %v1703_v8, %v698_v15 }
 0x952   : > { %v901_v31 = vpop.permute.xlu1 %900 }
 0x953   : > { %v903_v32 = vmul.f32 %v1703_v8, %v901_v31 }
 0x955   : > { %905 = vrot.lane.b32.xlu0 %v903_v32, %s1895_s16 }
 0x9c7   : > { %v906_v9 = vpop.permute.xlu0 %905 }
 0x9c8   : > { %v908_v33 = vadd.f32 %v906_v9, %v892_v26 }
 0x9ca   : > { %1704 = vtanh.f32 %v908_v33 }
 0x9d7   : > { %v1705_v38 = vpop.eup %1704 }
 0x9d8   : > { %912 = vrot.lane.b32.xlu1 %v1705_v38, %s1896_s22 }
 0xa4a   : > { %v913_v40 = vpop.permute.xlu1 %912 }
 0xa4b   : > { %v915_v42 = vmul.f32 %v913_v40, %v910_v39 }
 0xa4d   : > { %v917_v43 = vadd.f32 %v916_v41, %v915_v42 }
 0xa4f   : > { %923 = vrot.lane.b32.xlu0 %v917_v43, %s1896_s22 }
 0xac1   : > { %v924_v44 = vpop.permute.xlu0 %923 }
 0xac2   : > { %1585 = vmatmul.mubr.msk.f32.vlgmr.msra.gmra.mxu1 %vm254_vm1, %v924_v44  ;;  %1596 = vmatmul.mubr.msk.f32.vlgmr.msra.gmra.mxu0 %vm254_vm1, %v924_v44  ;;  %v1203_v44 = vld [vmem:[#allocation9 + $0xb8] sm:$0xff] }
 0xac3   : > { %1600 = vmatprep.mubr.msk.bf16.mxu1 %vm1893_vm0, %v1892_v0  ;;  %1612 = vmatprep.mubr.msk.f32.mxu0 %vm1893_vm0, %v1892_v0 }
 0xb82   : > { %v993_v45 = vpop.f32.mrf.mxu1  ;;  %v1064_v46 = vpop.f32.mrf.mxu0 }
 0xb83   : > { %v997_v47 = vpack.c.bf16 %v993_v45, %v993_v45  ;;  %v1202_v45 = vld [vmem:[#allocation9 + $0xb0] sm:$0xff] }
 0xb84   : > { %v1586_v48 = vpop.f32.mrf.mxu1  ;;  %v1597_v49 = vpop.f32.mrf.mxu0 }
 0xb85   : > { %v1069_v50 = vsel %vm403_vm2, %v997_v47, 0 }
 0xb86   : > { %1599 = vmatpush3.bf16.msra.mxu1 %v1069_v50 }
 0xb89   : > { %1601 = vmatmul.mubr.msk.bf16.vlgmr.msra.gmra.mxu1 %vm399_vm3, %v2132_v14  ;;  %v1432_v14 = vld [vmem:[#allocation9 + $0xa2] ss:$0 sm:$0xff] }
 0xc49   : > { %v1105_v51 = vpop.f32.mrf.mxu1 }
 0xc4a   : > { %v1106_v52 = vadd.f32 %v1105_v51, %v1064_v46  ;;  %v1201_v46 = vld [vmem:[#allocation9 + $0xa8] sm:$0xff] }
 0xc4b   : > { %v1602_v53 = vpop.f32.mrf.mxu1 }
 0xc4c   : > { %v1111_v54 = vadd.f32 %v2147_v17, %v1106_v52 }
 0xc4d   : > { %v1108_v55 = vpop.f32.mrf.mxu1 }
 0xc4e   : > { %1119 = vrot.lane.b32.xlu1 %v1111_v54, %s1894_s23  ;;  %v1431_v57 = vmul.f32 -1.442695, %v1111_v54 }
 0xc4f   : > { %v1603_v56 = vpop.f32.mrf.mxu1 }
 0xc50   : > { %1706 = vpow2.f32 %v1431_v57  ;;  %v1283_v57 = vsub.s32 0, %v1162_v24 }
 0xc5d   : > { %v1707_v58 = vpop.eup %1706 }
 0xc5e   : > { %v1115_v59 = vadd.f32 1.0, %v1707_v58 }
 0xc60   : > { %1708 = vrcp.f32 %v1115_v59 }
 0xc6d   : > { %v1709_v60 = vpop.eup %1708 }
 0xc6e   : > { %v1129_v2 = vsub.f32 1.0, %v1709_v60  ;;  %v1135_v6 = vmul.f32 %v1709_v60, %v917_v43  ;;  %v1204_v43 = vld [vmem:[#allocation9 + $0xc0] sm:$0xff] }
 0xc6f   : > { %1605 = vmatpush3.msra.mxu0 %v1204_v43 }
 0xc70   : > { %1606 = vmatprep.subr.mxu0 %v1892_v0 }
 0xc71   : > { %1607 = vmatpush3.msra.mxu0 %v1203_v44 }
 0xc72   : > { %1608 = vmatprep.subr.mxu0 %v1892_v0 }
 0xc73   : > { %1609 = vmatpush3.msra.mxu0 %v1202_v45 }
 0xc74   : > { %1610 = vmatprep.subr.mxu0 %v1892_v0  ;;  %v1205_v0 = vld [vmem:[#allocation9 + $0xa1] sm:$0x1] }
 0xc75   : > { %1611 = vmatpush3.msra.mxu0 %v1201_v46 }
 0xcc0   : > { %v1120_v61 = vpop.permute.xlu1 %1119 }
 0xcc1   : > { %v1122_v62 = vmul.f32 %v1709_v60, %v1120_v61 }
 0xcc3   : > { %1124 = vrot.lane.b32.xlu0 %v1122_v62, %s1895_s16 }
 0xcc7   : > { %1143 = vrot.lane.b32.xlu0 %v1432_v14, %s1894_s23 }
 0xd35   : > { %v1125_v63 = vpop.permute.xlu0 %1124 }
 0xd36   : > { %v1127_v1 = vadd.f32 %v1125_v63, %v1111_v54 }
 0xd38   : > { %1710 = vtanh.f32 %v1127_v1 }
 0xd39   : > { %v1144_v10 = vpop.permute.xlu0 %1143 }
 0xd45   : > { %v1711_v17 = vpop.eup %1710 }
 0xd46   : > { %1131 = vrot.lane.b32.xlu1 %v1711_v17, %s1896_s22 }
 0xdb8   : > { %v1132_v4 = vpop.permute.xlu1 %1131 }
 0xdb9   : > { %v1134_v5 = vmul.f32 %v1132_v4, %v1129_v2 }
 0xdbb   : > { %v1136_v11 = vadd.f32 %v1135_v6, %v1134_v5 }
 0xdbd   : > { %v1146_v12 = vmul.f32 %v1144_v10, %v1136_v11 }
 0xdbf   : > { %1148 = vrot.lane.b32.xlu1 %v1146_v12, %s1896_s22 }
 0xe31   : > { %v1149_v13 = vpop.permute.xlu1 %1148 }
 0xe32   : > { %v1151_v15 = vsel %vm254_vm1, %v1149_v13, 0.0 }
 0xe33   : > { %1152 = vadd.xlane.f32.xlu0 %v1151_v15 }
 0xebc   : > { %v1153_v18 = vpop.xlane.xlu0 %1152 }
 0xebd   : > { %v1154_v19 = vadd.f32 %v1432_v14, %v1153_v18 }
 0xebf   : > { %v1433_v20 = vmul.f32 -1.442695, %v1154_v19 }
 0xec1   : > { %1712 = vpow2.f32 %v1433_v20 }
 0xece   : > { %v1713_v21 = vpop.eup %1712 }
 0xecf   : > { %v1158_v22 = vadd.f32 1.0, %v1713_v21 }
 0xed1   : > { %1714 = vrcp.f32 %v1158_v22 }
 0xede   : > { %v1715_v3 = vpop.eup %1714 }
 0xedf   : > { %v1166_v26 = vsel %vm1165_vm4, %v1715_v3, -inf }
 0xee0   : > { %v1168_v27 = vsel %vm1167_vm5, %v1166_v26, -inf }
 0xee1   : > { %v1169_v28 = vrot.slane %v1168_v27, 4 }
 0xee3   : > { %v1170_v7 = vmax.f32 %v1168_v27, %v1169_v28 }
 0xee5   : > { %v1171_v29 = vrot.slane %v1170_v7, 2 }
 0xee7   : > { %v1172_v30 = vmax.f32 %v1170_v7, %v1171_v29 }
 0xee9   : > { %v1173_v8 = vrot.slane %v1172_v30, 1 }
 0xeeb   : > { %v1174_v31 = vmax.f32 %v1172_v30, %v1173_v8 }
 0xeed   : > { %v1175_v32 = vsub.f32 %v1166_v26, %v1174_v31 }
 0xeef   : > { %v1176_v9 = vmul.f32 1.442695, %v1175_v32 }
 0xef1   : > { %1716 = vpow2.f32 %v1176_v9 }
 0xefe   : > { %v1717_v33 = vpop.eup %1716 }
 0xeff   : > { %v1178_v34 = vsel %vm1167_vm5, %v1717_v33, 0.0 }
 0xf00   : > { %v1179_v35 = vrot.slane %v1178_v34, 4 }
 0xf02   : > { %v1180_v36 = vadd.f32 %v1179_v35, %v1178_v34 }
 0xf04   : > { %v1181_v37 = vrot.slane %v1180_v36, 2 }
 0xf06   : > { %v1182_v38 = vadd.f32 %v1181_v37, %v1180_v36 }
 0xf08   : > { %v1183_v39 = vrot.slane %v1182_v38, 1 }
 0xf0a   : > { %v1184_v40 = vadd.f32 %v1183_v39, %v1182_v38 }
 0xf0c   : > { %1718 = vrcp.f32 %v1184_v40 }
 0xf19   : > { %v1719_v41 = vpop.eup %1718 }
 0xf1a   : > { %v1186_v42 = vmul.f32 %v1719_v41, %v1717_v33 }
 0xf1c   : > { %1189 = vperm.xlu1 %1686, %v1186_v42  }
 0xf97   : > { %v1190_v47 = vpop.permute.xlu1 %1189 }
 0xf98   : > { %v1192_v48 = vmul.f32 %v1190_v47, %v1136_v11 }
 0xf9a   : > { %v1194_v49 = vsel %vm1193_vm6, %v1192_v48, 0.0 }
 0xf9b   : > { %v1195_v50 = vrot.slane %v1194_v49, 4 }
 0xf9d   : > { %v1196_v51 = vadd.f32 %v1195_v50, %v1194_v49 }
 0xf9f   : > { %v1197_v52 = vrot.slane %v1196_v51, 2 }
 0xfa1   : > { %v1198_v53 = vadd.f32 %v1197_v52, %v1196_v51 }
 0xfa3   : > { %v1199_v54 = vrot.slane %v1198_v53, 1 }
 0xfa5   : > { %v1200_v55 = vadd.f32 %v1199_v54, %v1198_v53 }
 0xfa7   : > { %1207 = vrot.lane.b32.xlu1 %v1200_v55, %s1896_s22 }
0x1019   : > { %v1208_v56 = vpop.permute.xlu1 %1207 }
0x101a   : > { %1613 = vmatmul.mubr.msk.f32.vlgmr.msra.gmra.mxu0 %vm254_vm1, %v1208_v56 }
0x10da   : > { %v1277_v58 = vpop.f32.mrf.mxu0 }
0x10db   : > { %v1278_v59 = vadd.f32 %v1277_v58, %v1205_v0 }
0x10dc   : > { %v1614_v60 = vpop.f32.mrf.mxu0 }
0x10dd   : > { %v1284_v61 = vrot.slane %v1278_v59, %v1283_v57 }
0x10df   : > { %1285 = vst [vmem:[%s241_s26] sm:$0xff] %v1284_v61 }
0x10e0   : > { %1823 = shalt.err (!%p1820_p9)
}
0x10e1   : > { %s1824_s28 = scalar_lea.hbm %s1298_s8, 128  ;;  %s1828_s15 = scalar_lea.hbm %s2281_s4, 256 }
0x10e2   : > { %p1825_p1 = scmp.ne.s32.totalorder %s1298_s8, %s1824_s28  ;;  %p1829_p7 = scmp.lt.s32.totalorder %s1298_s8, %s2281_s4 }
0x10e3   : > { %p1830_p11 = scmp.lt.s32.totalorder %s1828_s15, %s1824_s28 }
0x10e4   : > { %p1826_p4 = pnand %p1825_p1, %p2297_p10 }
0x10e5   : > { %p1831_p8 = por %p1830_p11, %p1829_p7 }
0x10e6   : > { %p1827_p6 = pneg %p1826_p4 }
0x10e8   : > { %p1832_p3 = pnand %p1831_p8, %p1827_p6 }
0x10ea   : > { %1835 = shalt.err (!%p1832_p3)
}
0x10eb   : > { %1623 = dma.vmem_to_hbm [thread:$0]  (%p2297_p10), %s1301_s6, 128, %s1298_s8, %s1287_s17  }
0x10ec PF: > { %s1312_s22 = sand.u32 1, %s1872_s18   ;;  %p2298_p2 = scmp.ne.s32.totalorder %s2287_s24, 0 }
0x10ed   : > { %p2299_p12 = scmp.ge.s32.totalorder %s1884_s21, 2  ;;  %s1313_s27 = scalar_lea.sflag [#allocation6], %s1312_s22 }
0x10ef   : > { %p1637_p13 = pnand %p2299_p12, %p2298_p2 }
0x10f1   : > { %p1638_p0 = pneg %p1637_p13 }
0x10f3   : > { %1867 = dma.done.wait (%p1638_p0), %s1313_s27, 128  }
0x10f4   : > { %1869 = vsyncadd (%p1638_p0), %s1313_s27, 4294967168  ;;  %p24_p5 = scmp.ge.s32.totalorder %s1981_s29, 4   ;;  %s2300_s18 = smov %s1876_s19 }
0x10f5   : > { %s2301_s19 = smov %s1880_s20  ;;  %s2302_s20 = smov %s1998_s11 }
0x10f6   : > { %s2303_s21 = smov %s1981_s29  ;;  %26 = sbr.rel (!%p24_p5) target bundleno = 12 (0xc), region = 94 }
0x10fb   :  { %1318 = vsyncpa [#allocation5], 1 }
0x10fc   :  { %1320 = vsyncpa [#allocation5 + $0x1], 1 }
0x10fd   :  { %1321 = vsyncpa [#allocation8], 1 }
0x10fe   :  { %1323 = vsyncpa [#allocation8 + $0x1], 1 }
0x10ff   :  { %1324 = vsyncpa [#allocation6], 1 }
0x1100   :  { %1326 = vsyncpa [#allocation6 + $0x1], 1 }

</bundles_post_ra>
